<compile_context>
chip_gen: v6e
topology: v6e:2x2x1
jax: 0.10.0
libtpu: 0.0.40
codegen_flags: <defaults>
</compile_context>

<pallas_src>
import jax
import jax.numpy as jnp
from jax.experimental import pallas as pl
from jax.experimental.pallas import tpu as pltpu
import numpy as np


def _make_fused_forward_kernel(layer_layout):
    """Build the fused kernel.

    layer_layout: static tuple of (row_offset, d_in, d_out) per layer, indexing
    into the packed parameter slab:
        rows [row, row+d_in)        -> W      [d_in, d_out]
        rows [row+d_in, row+d_in+5) -> a0..a4 [5,   d_out]
    """

    def kernel(x_ref, slab_ref, o_ref):
        slab = slab_ref[...]                       # whole param slab, VMEM resident
        x = x_ref[...].astype(jnp.float32)         # [Bblk, d_in]

        for (row, din, dout) in layer_layout:
            w = slab[row:row + din, :dout]         # [din, dout]
            a = slab[row + din:row + din + 5, :dout]

            # z = x @ w as unrolled VPU broadcast-FMAs (din <= 8): avoids the
            # MXU push/pop latency entirely at these tiny widths.
            z = x[:, 0:1] * w[0:1, :]
            for i in range(1, din):
                z = z + x[:, i:i + 1] * w[i:i + 1, :]
            # NOTE: Node.params[0] (bias) is hard-set to 0 in the module, so
            # the bias add is dropped entirely.

            a0 = a[0:1, :]
            a1 = a[1:2, :]
            a2 = a[2:3, :]
            a3 = a[3:4, :]
            a4 = a[4:5, :]
            # tanh/sin go to the EUP; the a3*z + a4 term is independent VPU
            # filler under the EUP pushes.  Keep everything f32 (v5e VPU/EUP
            # have no bf16 path).
            x = a0 * jnp.tanh(z) * jnp.sin(a1 * z + a2) + a3 * z + a4

        # Fused softmax tail (float32, max-subtracted).  Exact division: the
        # denominator is a [Bblk, 1] vector, so the divide is essentially free
        # and rows sum to 1 up to f32 rounding.
        m = jnp.max(x, axis=1, keepdims=True)
        e = jnp.exp(x - m)
        s = jnp.sum(e, axis=1, keepdims=True)
        o_ref[...] = e / s

    return kernel


def _pack_layer_params(params):
    """Pack all layers' (W, P) into one zero-padded slab.

    params: list of (W [Din, Dout] f32, P [5, Dout] f32) with P rows = a0..a4.
    Returns (slab [total_rows, max_dout] f32, layout tuple of (row, din, dout)).
    Each layer's section is padded to a multiple of 8 rows so every in-kernel
    slice starts on a sublane-aligned offset.
    """
    max_dout = max(w.shape[1] for (w, _) in params)
    blocks, layout, off = [], [], 0
    for (w, p) in params:
        din, dout = w.shape
        assert p.shape == (5, dout)
        blocks.append(jnp.pad(w.astype(jnp.float32), ((0, 0), (0, max_dout - dout))))
        blocks.append(jnp.pad(p.astype(jnp.float32), ((0, 0), (0, max_dout - dout))))
        layout.append((off, din, dout))
        sect = din + 5
        pad_rows = (-sect) % 8
        if pad_rows:
            blocks.append(jnp.zeros((pad_rows, max_dout), jnp.float32))
        off += sect + pad_rows
    slab = jnp.concatenate(blocks, axis=0)
    return slab, tuple(layout)


def network_forward(data, params):
    """Single fused pallas_call for the entire forward pass.

    data:   [B, D_in] float32
    params: list of (W [Din, Dout], P [5, Dout]) with P rows 0..4 = a0..a4.
    """
    B, d_in = data.shape
    d_out = params[-1][0].shape[1]

    slab, layout = _pack_layer_params(params)
    kernel = _make_fused_forward_kernel(layout)

    # Batch grid axis: amortizes one launch over many rows; "parallel" lets the
    # runtime shard batch blocks across TensorCores (2 TCs on v7x).
    block_b = B if B <= 512 else 512
    assert B % block_b == 0, "batch must divide evenly into batch blocks"
    grid = (B // block_b,)

    return pl.pallas_call(
        kernel,
        out_shape=jax.ShapeDtypeStruct((B, d_out), jnp.float32),
        grid=grid,
        in_specs=[
            pl.BlockSpec((block_b, d_in), lambda i: (i, 0)),   # data tile
            pl.BlockSpec(slab.shape, lambda i: (0, 0)),        # whole param slab
        ],
        out_specs=pl.BlockSpec((block_b, d_out), lambda i: (i, 0)),
        compiler_params=pltpu.CompilerParams(
            dimension_semantics=("parallel",)),
    )(data, slab)


def init_network_params(key, layer_sizes):
    """Deterministic parameters mirroring Network.__init__/addlayer.

    Returns list of (W [Din, Dout], P [5, Dout]) per non-input layer, where
    P rows 0..4 are a0..a4 (~U[0,1), like torch.rand); params[6] is unused by
    forward and the bias (Node.params[0]) is identically zero, so both are
    omitted.
    """
    params = []
    for l in range(1, len(layer_sizes)):
        din, dout = layer_sizes[l - 1], layer_sizes[l]
        key, kw, kp = jax.random.split(key, 3)
        w = jax.random.uniform(kw, (din, dout), dtype=jnp.float32)      # link weights ~ random.random()
        node_p = jax.random.uniform(kp, (7, dout), dtype=jnp.float32)   # Node.params ~ torch.rand(7)
        p = node_p[1:6, :]                                              # a0..a4
        params.append((w, p))
    return params


def network_forward_ref(data, params):
    """Pure-JAX reference for correctness checking (f32, highest precision)."""
    x = data
    for (w, p) in params:
        z = jnp.einsum("bi,io->bo", x, w, precision=jax.lax.Precision.HIGHEST)
        a0, a1, a2, a3, a4 = p
        x = a0 * jnp.tanh(z) * jnp.sin(a1 * z + a2) + a3 * z + a4
    return jax.nn.softmax(x.astype(jnp.float32), axis=1)


if __name__ == "__main__":
    key = jax.random.PRNGKey(0)
    batch = 8
    layer_sizes = [4, 8, 4]          # input layer of 4 nodes, hidden 8, output 4

    key, kd = jax.random.split(key)
    data = jax.random.normal(kd, (batch, layer_sizes[0]), dtype=jnp.float32)

    params = init_network_params(key, layer_sizes)

    out = network_forward(data, params)
    out = jax.block_until_ready(out)

    ref = network_forward_ref(data, params)
    assert out.shape == (batch, layer_sizes[-1])
    # Element compare vs. the XLA reference (allows for tanh/sin/exp
    # implementation differences between Mosaic and XLA).
    assert np.allclose(np.asarray(out), np.asarray(ref), atol=1e-3, rtol=1e-3)
    # Exact softmax division -> rows sum to 1 up to f32 rounding.
    assert np.allclose(np.asarray(out).sum(axis=1), 1.0, atol=1e-5)

    print("KERNEL_OK")
</pallas_src>

<mosaic_0001>
module attributes {stable_mosaic.version = 11 : i64} {
  func.func @kernel(%arg0: i32, %arg1: memref<8x4xf32, #tpu.memory_space<vmem>>, %arg2: memref<32x8xf32, #tpu.memory_space<vmem>>, %arg3: memref<8x4xf32, #tpu.memory_space<vmem>>) attributes {dimension_semantics = [#tpu.dimension_semantics<parallel>], iteration_bounds = array<i64: 1>, scalar_prefetch = 0 : i64, scratch_operands = 0 : i64, tpu.core_type = #tpu.core_type<tc>, window_params = [{transform_indices = @transform_0, window_bounds = array<i64: 8, 4>}, {pipeline_mode = #tpu.pipeline_mode<synchronous>, transform_indices = @transform_1, window_bounds = array<i64: 32, 8>}, {transform_indices = @transform_2, window_bounds = array<i64: 8, 4>}]} {
    %c0 = arith.constant 0 : index
    %c0_0 = arith.constant 0 : index
    %0 = vector.load %arg2[%c0, %c0_0] : memref<32x8xf32, #tpu.memory_space<vmem>>, vector<32x8xf32>
    %c0_1 = arith.constant 0 : index
    %c0_2 = arith.constant 0 : index
    %1 = vector.load %arg1[%c0_1, %c0_2] : memref<8x4xf32, #tpu.memory_space<vmem>>, vector<8x4xf32>
    %2 = vector.extract_strided_slice %0 {offsets = [0, 0], sizes = [4, 8], strides = [1, 1]} : vector<32x8xf32> to vector<4x8xf32>
    %3 = vector.extract_strided_slice %0 {offsets = [4, 0], sizes = [5, 8], strides = [1, 1]} : vector<32x8xf32> to vector<5x8xf32>
    %4 = vector.extract_strided_slice %1 {offsets = [0, 0], sizes = [8, 1], strides = [1, 1]} : vector<8x4xf32> to vector<8x1xf32>
    %5 = vector.extract_strided_slice %2 {offsets = [0, 0], sizes = [1, 8], strides = [1, 1]} : vector<4x8xf32> to vector<1x8xf32>
    %6 = vector.broadcast %4 : vector<8x1xf32> to vector<8x8xf32>
    %7 = vector.broadcast %5 : vector<1x8xf32> to vector<8x8xf32>
    %8 = arith.mulf %6, %7 : vector<8x8xf32>
    %9 = vector.extract_strided_slice %1 {offsets = [0, 1], sizes = [8, 1], strides = [1, 1]} : vector<8x4xf32> to vector<8x1xf32>
    %10 = vector.extract_strided_slice %2 {offsets = [1, 0], sizes = [1, 8], strides = [1, 1]} : vector<4x8xf32> to vector<1x8xf32>
    %11 = vector.broadcast %9 : vector<8x1xf32> to vector<8x8xf32>
    %12 = vector.broadcast %10 : vector<1x8xf32> to vector<8x8xf32>
    %13 = arith.mulf %11, %12 : vector<8x8xf32>
    %14 = arith.addf %8, %13 : vector<8x8xf32>
    %15 = vector.extract_strided_slice %1 {offsets = [0, 2], sizes = [8, 1], strides = [1, 1]} : vector<8x4xf32> to vector<8x1xf32>
    %16 = vector.extract_strided_slice %2 {offsets = [2, 0], sizes = [1, 8], strides = [1, 1]} : vector<4x8xf32> to vector<1x8xf32>
    %17 = vector.broadcast %15 : vector<8x1xf32> to vector<8x8xf32>
    %18 = vector.broadcast %16 : vector<1x8xf32> to vector<8x8xf32>
    %19 = arith.mulf %17, %18 : vector<8x8xf32>
    %20 = arith.addf %14, %19 : vector<8x8xf32>
    %21 = vector.extract_strided_slice %1 {offsets = [0, 3], sizes = [8, 1], strides = [1, 1]} : vector<8x4xf32> to vector<8x1xf32>
    %22 = vector.extract_strided_slice %2 {offsets = [3, 0], sizes = [1, 8], strides = [1, 1]} : vector<4x8xf32> to vector<1x8xf32>
    %23 = vector.broadcast %21 : vector<8x1xf32> to vector<8x8xf32>
    %24 = vector.broadcast %22 : vector<1x8xf32> to vector<8x8xf32>
    %25 = arith.mulf %23, %24 : vector<8x8xf32>
    %26 = arith.addf %20, %25 : vector<8x8xf32>
    %27 = vector.extract_strided_slice %3 {offsets = [0, 0], sizes = [1, 8], strides = [1, 1]} : vector<5x8xf32> to vector<1x8xf32>
    %28 = vector.extract_strided_slice %3 {offsets = [1, 0], sizes = [1, 8], strides = [1, 1]} : vector<5x8xf32> to vector<1x8xf32>
    %29 = vector.extract_strided_slice %3 {offsets = [2, 0], sizes = [1, 8], strides = [1, 1]} : vector<5x8xf32> to vector<1x8xf32>
    %30 = vector.extract_strided_slice %3 {offsets = [3, 0], sizes = [1, 8], strides = [1, 1]} : vector<5x8xf32> to vector<1x8xf32>
    %31 = vector.extract_strided_slice %3 {offsets = [4, 0], sizes = [1, 8], strides = [1, 1]} : vector<5x8xf32> to vector<1x8xf32>
    %32 = math.tanh %26 : vector<8x8xf32>
    %33 = vector.broadcast %27 : vector<1x8xf32> to vector<8x8xf32>
    %34 = arith.mulf %33, %32 : vector<8x8xf32>
    %35 = vector.broadcast %28 : vector<1x8xf32> to vector<8x8xf32>
    %36 = arith.mulf %35, %26 : vector<8x8xf32>
    %37 = vector.broadcast %29 : vector<1x8xf32> to vector<8x8xf32>
    %38 = arith.addf %36, %37 : vector<8x8xf32>
    %39 = math.sin %38 : vector<8x8xf32>
    %40 = arith.mulf %34, %39 : vector<8x8xf32>
    %41 = vector.broadcast %30 : vector<1x8xf32> to vector<8x8xf32>
    %42 = arith.mulf %41, %26 : vector<8x8xf32>
    %43 = arith.addf %40, %42 : vector<8x8xf32>
    %44 = vector.broadcast %31 : vector<1x8xf32> to vector<8x8xf32>
    %45 = arith.addf %43, %44 : vector<8x8xf32>
    %46 = vector.extract_strided_slice %0 {offsets = [16, 0], sizes = [8, 4], strides = [1, 1]} : vector<32x8xf32> to vector<8x4xf32>
    %47 = vector.extract_strided_slice %0 {offsets = [24, 0], sizes = [5, 4], strides = [1, 1]} : vector<32x8xf32> to vector<5x4xf32>
    %48 = vector.extract_strided_slice %45 {offsets = [0, 0], sizes = [8, 1], strides = [1, 1]} : vector<8x8xf32> to vector<8x1xf32>
    %49 = vector.extract_strided_slice %46 {offsets = [0, 0], sizes = [1, 4], strides = [1, 1]} : vector<8x4xf32> to vector<1x4xf32>
    %50 = vector.broadcast %48 : vector<8x1xf32> to vector<8x4xf32>
    %51 = vector.broadcast %49 : vector<1x4xf32> to vector<8x4xf32>
    %52 = arith.mulf %50, %51 : vector<8x4xf32>
    %53 = vector.extract_strided_slice %45 {offsets = [0, 1], sizes = [8, 1], strides = [1, 1]} : vector<8x8xf32> to vector<8x1xf32>
    %54 = vector.extract_strided_slice %46 {offsets = [1, 0], sizes = [1, 4], strides = [1, 1]} : vector<8x4xf32> to vector<1x4xf32>
    %55 = vector.broadcast %53 : vector<8x1xf32> to vector<8x4xf32>
    %56 = vector.broadcast %54 : vector<1x4xf32> to vector<8x4xf32>
    %57 = arith.mulf %55, %56 : vector<8x4xf32>
    %58 = arith.addf %52, %57 : vector<8x4xf32>
    %59 = vector.extract_strided_slice %45 {offsets = [0, 2], sizes = [8, 1], strides = [1, 1]} : vector<8x8xf32> to vector<8x1xf32>
    %60 = vector.extract_strided_slice %46 {offsets = [2, 0], sizes = [1, 4], strides = [1, 1]} : vector<8x4xf32> to vector<1x4xf32>
    %61 = vector.broadcast %59 : vector<8x1xf32> to vector<8x4xf32>
    %62 = vector.broadcast %60 : vector<1x4xf32> to vector<8x4xf32>
    %63 = arith.mulf %61, %62 : vector<8x4xf32>
    %64 = arith.addf %58, %63 : vector<8x4xf32>
    %65 = vector.extract_strided_slice %45 {offsets = [0, 3], sizes = [8, 1], strides = [1, 1]} : vector<8x8xf32> to vector<8x1xf32>
    %66 = vector.extract_strided_slice %46 {offsets = [3, 0], sizes = [1, 4], strides = [1, 1]} : vector<8x4xf32> to vector<1x4xf32>
    %67 = vector.broadcast %65 : vector<8x1xf32> to vector<8x4xf32>
    %68 = vector.broadcast %66 : vector<1x4xf32> to vector<8x4xf32>
    %69 = arith.mulf %67, %68 : vector<8x4xf32>
    %70 = arith.addf %64, %69 : vector<8x4xf32>
    %71 = vector.extract_strided_slice %45 {offsets = [0, 4], sizes = [8, 1], strides = [1, 1]} : vector<8x8xf32> to vector<8x1xf32>
    %72 = vector.extract_strided_slice %46 {offsets = [4, 0], sizes = [1, 4], strides = [1, 1]} : vector<8x4xf32> to vector<1x4xf32>
    %73 = vector.broadcast %71 : vector<8x1xf32> to vector<8x4xf32>
    %74 = vector.broadcast %72 : vector<1x4xf32> to vector<8x4xf32>
    %75 = arith.mulf %73, %74 : vector<8x4xf32>
    %76 = arith.addf %70, %75 : vector<8x4xf32>
    %77 = vector.extract_strided_slice %45 {offsets = [0, 5], sizes = [8, 1], strides = [1, 1]} : vector<8x8xf32> to vector<8x1xf32>
    %78 = vector.extract_strided_slice %46 {offsets = [5, 0], sizes = [1, 4], strides = [1, 1]} : vector<8x4xf32> to vector<1x4xf32>
    %79 = vector.broadcast %77 : vector<8x1xf32> to vector<8x4xf32>
    %80 = vector.broadcast %78 : vector<1x4xf32> to vector<8x4xf32>
    %81 = arith.mulf %79, %80 : vector<8x4xf32>
    %82 = arith.addf %76, %81 : vector<8x4xf32>
    %83 = vector.extract_strided_slice %45 {offsets = [0, 6], sizes = [8, 1], strides = [1, 1]} : vector<8x8xf32> to vector<8x1xf32>
    %84 = vector.extract_strided_slice %46 {offsets = [6, 0], sizes = [1, 4], strides = [1, 1]} : vector<8x4xf32> to vector<1x4xf32>
    %85 = vector.broadcast %83 : vector<8x1xf32> to vector<8x4xf32>
    %86 = vector.broadcast %84 : vector<1x4xf32> to vector<8x4xf32>
    %87 = arith.mulf %85, %86 : vector<8x4xf32>
    %88 = arith.addf %82, %87 : vector<8x4xf32>
    %89 = vector.extract_strided_slice %45 {offsets = [0, 7], sizes = [8, 1], strides = [1, 1]} : vector<8x8xf32> to vector<8x1xf32>
    %90 = vector.extract_strided_slice %46 {offsets = [7, 0], sizes = [1, 4], strides = [1, 1]} : vector<8x4xf32> to vector<1x4xf32>
    %91 = vector.broadcast %89 : vector<8x1xf32> to vector<8x4xf32>
    %92 = vector.broadcast %90 : vector<1x4xf32> to vector<8x4xf32>
    %93 = arith.mulf %91, %92 : vector<8x4xf32>
    %94 = arith.addf %88, %93 : vector<8x4xf32>
    %95 = vector.extract_strided_slice %47 {offsets = [0, 0], sizes = [1, 4], strides = [1, 1]} : vector<5x4xf32> to vector<1x4xf32>
    %96 = vector.extract_strided_slice %47 {offsets = [1, 0], sizes = [1, 4], strides = [1, 1]} : vector<5x4xf32> to vector<1x4xf32>
    %97 = vector.extract_strided_slice %47 {offsets = [2, 0], sizes = [1, 4], strides = [1, 1]} : vector<5x4xf32> to vector<1x4xf32>
    %98 = vector.extract_strided_slice %47 {offsets = [3, 0], sizes = [1, 4], strides = [1, 1]} : vector<5x4xf32> to vector<1x4xf32>
    %99 = vector.extract_strided_slice %47 {offsets = [4, 0], sizes = [1, 4], strides = [1, 1]} : vector<5x4xf32> to vector<1x4xf32>
    %100 = math.tanh %94 : vector<8x4xf32>
    %101 = vector.broadcast %95 : vector<1x4xf32> to vector<8x4xf32>
    %102 = arith.mulf %101, %100 : vector<8x4xf32>
    %103 = vector.broadcast %96 : vector<1x4xf32> to vector<8x4xf32>
    %104 = arith.mulf %103, %94 : vector<8x4xf32>
    %105 = vector.broadcast %97 : vector<1x4xf32> to vector<8x4xf32>
    %106 = arith.addf %104, %105 : vector<8x4xf32>
    %107 = math.sin %106 : vector<8x4xf32>
    %108 = arith.mulf %102, %107 : vector<8x4xf32>
    %109 = vector.broadcast %98 : vector<1x4xf32> to vector<8x4xf32>
    %110 = arith.mulf %109, %94 : vector<8x4xf32>
    %111 = arith.addf %108, %110 : vector<8x4xf32>
    %112 = vector.broadcast %99 : vector<1x4xf32> to vector<8x4xf32>
    %113 = arith.addf %111, %112 : vector<8x4xf32>
    %cst = arith.constant dense<0xFF800000> : vector<8xf32>
    %114 = vector.multi_reduction <maximumf>, %113, %cst [1] : vector<8x4xf32> to vector<8xf32>
    %115 = vector.shape_cast %114 : vector<8xf32> to vector<8x1xf32>
    %116 = vector.broadcast %115 : vector<8x1xf32> to vector<8x4xf32>
    %117 = arith.subf %113, %116 : vector<8x4xf32>
    %118 = math.exp %117 : vector<8x4xf32>
    %cst_3 = arith.constant dense<0.000000e+00> : vector<8xf32>
    %119 = vector.multi_reduction <add>, %118, %cst_3 [1] : vector<8x4xf32> to vector<8xf32>
    %120 = vector.shape_cast %119 : vector<8xf32> to vector<8x1xf32>
    %121 = vector.broadcast %120 : vector<8x1xf32> to vector<8x4xf32>
    %122 = arith.divf %118, %121 : vector<8x4xf32>
    %c0_4 = arith.constant 0 : index
    %c0_5 = arith.constant 0 : index
    %123 = vector.load %arg3[%c0_4, %c0_5] : memref<8x4xf32, #tpu.memory_space<vmem>>, vector<8x4xf32>
    tpu.vector_store %arg3[%c0_4, %c0_5], %122 {strides = array<i32>} : memref<8x4xf32, #tpu.memory_space<vmem>>, vector<8x4xf32>,
    return
  }
  func.func @transform_0(%arg0: i32) -> (i32, i32) {
    %c0_i32 = arith.constant 0 : i32
    %c0_i32_0 = arith.constant 0 : i32
    return %arg0, %c0_i32 : i32, i32
  }
  func.func @transform_1(%arg0: i32) -> (i32, i32) {
    %c0_i32 = arith.constant 0 : i32
    %c0_i32_0 = arith.constant 0 : i32
    %c0_i32_1 = arith.constant 0 : i32
    return %c0_i32, %c0_i32_0 : i32, i32
  }
  func.func @transform_2(%arg0: i32) -> (i32, i32) {
    %c0_i32 = arith.constant 0 : i32
    %c0_i32_0 = arith.constant 0 : i32
    return %arg0, %c0_i32 : i32, i32
  }
}

</mosaic_0001>

<bundles_post_ra>
// kernel: tpu_custom_call.1
= control target key start
LH: loop header
LB: loop body
LE: loop exit
PB: predicated region body
PF: predicated region fallthrough
CT: control target
= control target key end

     0   :  { %v475_v0 = vmov 0   ;;  %v476_v2 = vmov 2   ;;  %v477_v3 = vmov 1   ;;  %v478_v4 = vmov 3   ;;  %s659_s0 = inlined_call_operand.vmem [shape: f32[8,4], index: 0, kind: input, shape index: {}]   ;;  %s660_s1 = inlined_call_operand.vmem [shape: f32[32,8], index: 1, kind: input, shape index: {}]   ;;  %s661_s2 = inlined_call_operand.vmem [shape: f32[8,4], index: 2, kind: output, shape index: {}]  }
   0x1   :  { %447 = vset.pattern.permute.xlu0 %v475_v0  ;;  %v15_v1 = vld [vmem:[%s659_s0] sm:$0xff]  ;;  %449 = vset.pattern.permute.xlu1 %v476_v2  ;;  %v21_v5 = vlaneseq  ;;  %v479_v50 = vmov 683565275   ;;  %v480_v52 = vmov 2475754826  }
   0x2   :  { %18 = vperm.xlu0 %447, %v15_v1   ;;  %37 = vperm.xlu1 %449, %v15_v1   ;;  %v11_v9 = vld [vmem:[%s660_s1] sm:$0xff]  ;;  %v481_v55 = vmov 2131351028   ;;  %v482_v58 = vmov 2102212464  }
   0x3   :  { %v509_v6 = vshrl.u32 %v21_v5, 7  ;;  %v483_v61 = vmov 920167782  }
   0x5   :  { %v512_v7 = vsub.s32 0, %v509_v6  ;;  %v515_v8 = vsub.s32 1, %v509_v6  ;;  %v521_v11 = vsub.s32 2, %v509_v6  ;;  %v524_v13 = vsub.s32 3, %v509_v6 }
   0x6   :  { %448 = vset.pattern.permute.xlu0 %v477_v3  ;;  %450 = vset.pattern.permute.xlu1 %v478_v4  ;;  %v64_v22 = vsub.s32 5, %v509_v6  ;;  %v179_v23 = vsub.s32 7, %v509_v6  ;;  %v69_v26 = vsub.s32 6, %v509_v6  ;;  %v545_v37 = vsub.s32 4, %v509_v6 }
   0x7   :  { %27 = vperm.xlu0 %448, %v15_v1   ;;  %47 = vperm.xlu1 %450, %v15_v1   ;;  %v24_v14 = vrot.slane %v11_v9, %v512_v7  ;;  %v33_v15 = vrot.slane %v11_v9, %v515_v8  ;;  %v43_v16 = vrot.slane %v11_v9, %v521_v11 }
   0x8   :  { %v53_v17 = vrot.slane %v11_v9, %v524_v13  ;;  %v65_v28 = vrot.slane %v11_v9, %v64_v22  ;;  %v180_v29 = vrot.slane %v11_v9, %v179_v23  ;;  %v70_v31 = vrot.slane %v11_v9, %v69_v26 }
   0x9   :  { %v60_v40 = vrot.slane %v11_v9, %v545_v37 }
   0xb   :  { %451 = vset.pattern.permute.xlu1 %v475_v0  ;;  %v484_v0 = vmov 1326507024  }
  0x7d   :  { %v19_v10 = vpop.permute.xlu0 %18  ;;  %v38_v12 = vpop.permute.xlu1 %37 }
  0x7e   :  { %v25_v20 = vmul.f32 %v24_v14, %v19_v10  ;;  %v44_v24 = vmul.f32 %v43_v16, %v38_v12 }
  0x82   :  { %v28_v18 = vpop.permute.xlu0 %27  ;;  %v48_v19 = vpop.permute.xlu1 %47 }
  0x83   :  { %v34_v21 = vmul.f32 %v33_v15, %v28_v18  ;;  %v54_v27 = vmul.f32 %v53_v17, %v48_v19 }
  0x85   :  { %v35_v25 = vadd.f32 %v34_v21, %v25_v20 }
  0x87   :  { %v45_v30 = vadd.f32 %v44_v24, %v35_v25 }
  0x89   :  { %v55_v32 = vadd.f32 %v54_v27, %v45_v30 }
  0x8b   :  { %459 = vtanh.f32 %v55_v32  ;;  %v66_v33 = vmul.f32 %v65_v28, %v55_v32  ;;  %v539_v34 = vmul.f32 %v180_v29, %v55_v32 }
  0x8d   :  { %v541_v35 = vadd.f32 %v70_v31, %v66_v33 }
  0x8f   :  { %v75_v36 = vand.u32 2139095040, %v541_v35  ;;  %v72_v42 = vand.u32 2147483647, %v541_v35  ;;  %vm74_vm7 = vcmp.lt.s32.totalorder %v541_v35, 0  ;;  %vm164_vm12 = vweird.f32 %v541_v35 }
  0x91   :  { %v76_v38 = vshrl.u32 %v75_v36, 23  ;;  %v79_v47 = vand.u32 8388607, %v72_v42  ;;  %vm73_vm8 = vcmp.le.f32.partialorder %v72_v42, 0.7853982  ;;  %v12_v42 = vld [vmem:[%s660_s1 + $0x8] sm:$0xff] }
  0x93   :  { %v417_v39 = vadd.s32 4294967169, %v76_v38  ;;  %v80_v3 = vor.u32 8388608, %v79_v47 }
  0x95   :  { %v82_v41 = vadd.s32 1, %v417_v39  ;;  %v120_v25 = vshll.u32 %v80_v3, 8 }
  0x97   :  { %vm83_vm0 = vcmp.gt.s32.totalorder %v82_v41, 0 }
  0x98   :  { %v460_v43 = vpop.eup %459  ;;  %v84_v44 = vsel %vm83_vm0, %v82_v41, 0 }
  0x99   :  { %v549_v45 = vmul.f32 %v460_v43, %v60_v40  ;;  %v86_v46 = vand.u32 31, %v84_v44  ;;  %v85_v49 = vshrl.u32 %v84_v44, 5 }
  0x9b   :  { %v87_v48 = vsub.s32 32, %v86_v46  ;;  %v89_v51 = vshll.u32 %v479_v50, %v86_v46  ;;  %v92_v53 = vshll.u32 %v480_v52, %v86_v46  ;;  %v95_v57 = vshll.u32 %v481_v55, %v86_v46 }
  0x9c   :  { %v98_v60 = vshll.u32 %v482_v58, %v86_v46  ;;  %v101_v63 = vshll.u32 %v483_v61, %v86_v46  ;;  %vm104_vm1 = vcmp.lt.s32.totalorder %v85_v49, 1  ;;  %vm107_vm2 = vcmp.lt.s32.totalorder %v85_v49, 4 }
  0x9d   :  { %v90_v54 = vshrl.u32 %v480_v52, %v87_v48  ;;  %v93_v56 = vshrl.u32 %v481_v55, %v87_v48  ;;  %v96_v59 = vshrl.u32 %v482_v58, %v87_v48  ;;  %v99_v62 = vshrl.u32 %v483_v61, %v87_v48 }
  0x9e   :  { %v102_v1 = vshrl.u32 %v484_v0, %v87_v48  ;;  %v88_v18 = vshrl.u32 %v479_v50, %v87_v48  ;;  %vm106_vm3 = vcmp.lt.s32.totalorder %v85_v49, 3  ;;  %vm105_vm4 = vcmp.lt.s32.totalorder %v85_v49, 2 }
  0x9f   :  { %v91_v5 = vor.u32 %v90_v54, %v89_v51  ;;  %v94_v9 = vor.u32 %v93_v56, %v92_v53  ;;  %v97_v10 = vor.u32 %v96_v59, %v95_v57  ;;  %v100_v12 = vor.u32 %v99_v62, %v98_v60 }
  0xa0   :  { %v103_v14 = vor.u32 %v102_v1, %v101_v63 }
  0xa1   :  { %v109_v15 = vsel %vm107_vm2, %v97_v10, 2102212464  ;;  %v112_v16 = vsel %vm104_vm1, %v91_v5, %v94_v9  ;;  %v116_v17 = vsel %vm104_vm1, %v94_v9, %v97_v10  ;;  %v113_v19 = vsel %vm107_vm2, %v100_v12, 920167782 }
  0xa2   :  { %v117_v20 = vsel %vm107_vm2, %v103_v14, 1326507024  ;;  %v114_v21 = vsel %vm106_vm3, %v97_v10, %v113_v19  ;;  %v108_v27 = vsel %vm104_vm1, %v88_v18, %v91_v5  ;;  %v110_v28 = vsel %vm106_vm3, %v94_v9, %v109_v15 }
  0xa3   :  { %v118_v24 = vsel %vm106_vm3, %v100_v12, %v117_v20  ;;  %v115_v29 = vsel %vm105_vm4, %v112_v16, %v114_v21  ;;  %v111_v38 = vsel %vm105_vm4, %v108_v27, %v110_v28 }
  0xa4   :  { %v119_v30 = vsel %vm105_vm4, %v116_v17, %v118_v24  ;;  %v567_v33 = vmul.u32.u64.low %v120_v25, %v115_v29  ;;  %v568_v36 = vmul.u32.u64.high %v120_v25, %v115_v29, %v567_v33  ;;  %v127_v40 = vmul.u32 %v120_v25, %v111_v38 }
  0xa5   :  { %v564_v31 = vmul.u32.u64.low %v120_v25, %v119_v30  ;;  %v565_v32 = vmul.u32.u64.high %v120_v25, %v119_v30, %v564_v31 }
  0xa6   :  { %v130_v39 = vadd.s32 1, %v568_v36 }
  0xa7   :  { %vm129_vm5 = vc.u32 %v565_v32, %v567_v33  ;;  %v128_v57 = vadd.s32 %v567_v33, %v565_v32 }
  0xa8   :  { %v131_v41 = vsel %vm129_vm5, %v130_v39, %v568_v36  ;;  %v186_v36 = vrot.slane %v12_v42, %v512_v7 }
  0xa9   :  { %v132_v43 = vadd.s32 %v131_v41, %v127_v40  ;;  %v485_v41 = vmov 6  }
  0xab   :  { %v133_v44 = vadd.s32 536870912, %v132_v43 }
  0xad   :  { %v134_v46 = vshrl.u32 %v133_v44, 30 }
  0xaf   :  { %v135_v47 = vshll.u32 %v134_v46, 30  ;;  %v158_v16 = vsub.s32 4, %v134_v46 }
  0xb1   :  { %v136_v48 = vsub.s32 %v132_v43, %v135_v47  ;;  %v159_v19 = vsel %vm74_vm7, %v158_v16, %v134_v46  ;;  %v487_v43 = vmov 5  }
  0xb2   :  { %v161_v20 = vsel %vm73_vm8, 0, %v159_v19  ;;  %v604_v19 = vld [vmem:[%s660_s1 + $0x18] sm:$0xff] }
  0xb3   :  { %v138_v49 = vsub.s32 0, %v136_v48  ;;  %v165_v21 = vadd.s32 3, %v161_v20 }
  0xb5   :  { %v418_v51 = vmin.u32 %v138_v49, %v136_v48  ;;  %v166_v24 = vand.u32 3, %v165_v21 }
  0xb7   :  { %v140_v53 = vclz %v418_v51  ;;  %vm171_vm9 = vcmp.eq.s32.totalorder %v166_v24, 2  ;;  %vm168_vm10 = vcmp.eq.s32.totalorder %v166_v24, 0  ;;  %vm167_vm11 = vcmp.lt.s32.totalorder %v166_v24, 2 }
  0xb8   :  { %v282_v24 = vrot.slane %v604_v19, %v521_v11 }
  0xb9   :  { %v419_v54 = vadd.s32 4294967294, %v140_v53 }
  0xbb   :  { %vm420_vm6 = vcmp.lt.s32.totalorder %v419_v54, 0 }
  0xbc   :  { %v143_v56 = vsel %vm420_vm6, 0, %v419_v54 }
  0xbd   :  { %v144_v59 = vsub.s32 32, %v143_v56  ;;  %v148_v60 = vsub.s32 4294967266, %v143_v56  ;;  %v145_v62 = vshll.u32 %v136_v48, %v143_v56 }
  0xbf   :  { %v146_v63 = vshrl.u32 %v128_v57, %v144_v59  ;;  %v149_v1 = vadd.s32 127, %v148_v60 }
  0xc1   :  { %v147_v3 = vor.u32 %v146_v63, %v145_v62  ;;  %v150_v5 = vshll.u32 %v149_v1, 23 }
  0xc3   :  { %v151_v9 = vor.u32 4788187, %v150_v5  ;;  %v154_v12 = vcvt.s32.f32 %v147_v3 }
  0xc5   :  { %v152_v10 = vand.u32 2147483647, %v151_v9 }
  0xc7   :  { %v155_v14 = vmul.f32 %v154_v12, %v152_v10 }
  0xc9   :  { %v156_v15 = vxor.u32 2147483648, %v155_v14 }
  0xcb   :  { %v157_v17 = vsel %vm74_vm7, %v156_v15, %v155_v14 }
  0xcc   :  { %v160_v18 = vsel %vm73_vm8, %v541_v35, %v157_v17  ;;  %v486_v35 = vmov 4  }
  0xcd   :  { %461 = vcosq.f32 %v160_v18 }
  0xce   :  { %463 = vsinq.f32 %v160_v18 }
  0xda   :  { %v462_v25 = vpop.eup %461 }
  0xdb   :  { %v464_v27 = vpop.eup %463  ;;  %v172_v28 = vxor.u32 2147483648, %v462_v25 }
  0xdc   :  { %v169_v29 = vxor.u32 2147483648, %v464_v27 }
  0xdd   :  { %v173_v30 = vsel %vm171_vm9, %v172_v28, %v464_v27 }
  0xde   :  { %v170_v31 = vsel %vm168_vm10, %v462_v25, %v169_v29  ;;  %vm400_vm10 = vcmask 31744  }
  0xdf   :  { %v174_v32 = vsel %vm167_vm11, %v170_v31, %v173_v30 }
  0xe0   :  { %v175_v33 = vsel %vm164_vm12, nan, %v174_v32 }
  0xe1   :  { %v176_v38 = vmul.f32 %v175_v33, %v549_v45  ;;  %v488_v45 = vmov 7  }
  0xe3   :  { %v182_v39 = vadd.f32 %v539_v34, %v176_v38 }
  0xe5   :  { %v187_v40 = vadd.f32 %v186_v36, %v182_v39 }
  0xe7   :  { %199 = vperm.xlu0 %448, %v187_v40   ;;  %190 = vperm.xlu1 %451, %v187_v40  }
  0xeb   :  { %453 = vset.pattern.permute.xlu0 %v478_v4  ;;  %452 = vset.pattern.permute.xlu1 %v476_v2  ;;  %v13_v4 = vld [vmem:[%s660_s1 + $0x10] sm:$0xff] }
  0xec   :  { %219 = vperm.xlu0 %453, %v187_v40   ;;  %209 = vperm.xlu1 %452, %v187_v40   ;;  %v205_v2 = vrot.slane %v13_v4, %v515_v8  ;;  %v196_v34 = vrot.slane %v13_v4, %v512_v7  ;;  %v215_v49 = vrot.slane %v13_v4, %v521_v11 }
  0xed   :  { %v225_v54 = vrot.slane %v13_v4, %v524_v13  ;;  %v235_v60 = vrot.slane %v13_v4, %v545_v37  ;;  %v245_v5 = vrot.slane %v13_v4, %v64_v22  ;;  %v255_v9 = vrot.slane %v13_v4, %v69_v26 }
  0xee   :  { %v265_v16 = vrot.slane %v13_v4, %v179_v23  ;;  %v277_v22 = vrot.slane %v604_v19, %v515_v8 }
  0xf0   :  { %456 = vset.pattern.permute.xlu0 %v485_v41  ;;  %454 = vset.pattern.permute.xlu1 %v486_v35 }
  0xf1   :  { %249 = vperm.xlu0 %456, %v187_v40   ;;  %229 = vperm.xlu1 %454, %v187_v40  }
  0xf5   :  { %455 = vset.pattern.permute.xlu1 %v487_v43  ;;  %458 = vset.pattern.permute.xlu0 %v488_v45 }
  0xf6   :  { %239 = vperm.xlu1 %455, %v187_v40  }
  0xfa   :  { %457 = vset.pattern.permute.xlu1 %v488_v45 }
  0xfb   :  { %259 = vperm.xlu1 %457, %v187_v40  }
 0x162   :  { %v200_v44 = vpop.permute.xlu0 %199  ;;  %v191_v46 = vpop.permute.xlu1 %190 }
 0x163   :  { %v206_v47 = vmul.f32 %v205_v2, %v200_v44  ;;  %v197_v48 = vmul.f32 %v196_v34, %v191_v46 }
 0x165   :  { %v207_v53 = vadd.f32 %v206_v47, %v197_v48 }
 0x167   :  { %v210_v51 = vpop.permute.xlu1 %209  ;;  %v220_v57 = vpop.permute.xlu0 %219 }
 0x168   :  { %v216_v56 = vmul.f32 %v215_v49, %v210_v51  ;;  %v226_v62 = vmul.f32 %v225_v54, %v220_v57 }
 0x16a   :  { %v217_v59 = vadd.f32 %v216_v56, %v207_v53 }
 0x16c   :  { %v230_v63 = vpop.permute.xlu1 %229  ;;  %v227_v1 = vadd.f32 %v226_v62, %v217_v59  ;;  %v250_v10 = vpop.permute.xlu0 %249 }
 0x16d   :  { %v236_v3 = vmul.f32 %v235_v60, %v230_v63  ;;  %v256_v17 = vmul.f32 %v255_v9, %v250_v10 }
 0x16f   :  { %v237_v14 = vadd.f32 %v236_v3, %v227_v1 }
 0x171   :  { %v240_v12 = vpop.permute.xlu1 %239 }
 0x172   :  { %v246_v15 = vmul.f32 %v245_v5, %v240_v12 }
 0x174   :  { %v247_v18 = vadd.f32 %v246_v15, %v237_v14 }
 0x176   :  { %v257_v20 = vadd.f32 %v256_v17, %v247_v18  ;;  %v260_v21 = vpop.permute.xlu1 %259 }
 0x177   :  { %v266_v26 = vmul.f32 %v265_v16, %v260_v21 }
 0x179   :  { %v610_v25 = vadd.f32 %v266_v26, %v257_v20 }
 0x17b   :  { %v278_v6 = vmul.f32 %v277_v22, %v610_v25 }
 0x17d   :  { %v613_v23 = vadd.f32 %v282_v24, %v278_v6 }
 0x17f   :  { %v287_v27 = vand.u32 2139095040, %v613_v23  ;;  %v284_v42 = vand.u32 2147483647, %v613_v23  ;;  %vm286_vm4 = vcmp.lt.s32.totalorder %v613_v23, 0  ;;  %vm376_vm9 = vweird.f32 %v613_v23 }
 0x181   :  { %v288_v28 = vshrl.u32 %v287_v27, 23  ;;  %v291_v11 = vand.u32 8388607, %v284_v42  ;;  %vm285_vm5 = vcmp.le.f32.partialorder %v284_v42, 0.7853982 }
 0x183   :  { %v421_v29 = vadd.s32 4294967169, %v288_v28  ;;  %v292_v34 = vor.u32 8388608, %v291_v11 }
 0x185   :  { %v294_v30 = vadd.s32 1, %v421_v29 }
 0x187   :  { %vm295_vm13 = vcmp.gt.s32.totalorder %v294_v30, 0 }
 0x188   :  { %v296_v31 = vsel %vm295_vm13, %v294_v30, 0 }
 0x189   :  { %v298_v8 = vand.u32 31, %v296_v31  ;;  %v297_v33 = vshrl.u32 %v296_v31, 5 }
 0x18b   :  { %v299_v32 = vsub.s32 32, %v298_v8  ;;  %v301_v36 = vshll.u32 %v479_v50, %v298_v8  ;;  %v304_v38 = vshll.u32 %v480_v52, %v298_v8  ;;  %v307_v41 = vshll.u32 %v481_v55, %v298_v8 }
 0x18c   :  { %v310_v43 = vshll.u32 %v482_v58, %v298_v8  ;;  %v313_v4 = vshll.u32 %v483_v61, %v298_v8  ;;  %vm316_vm14 = vcmp.lt.s32.totalorder %v297_v33, 1  ;;  %vm319_vm15 = vcmp.lt.s32.totalorder %v297_v33, 4 }
 0x18d   :  { %v302_v39 = vshrl.u32 %v480_v52, %v299_v32  ;;  %v305_v40 = vshrl.u32 %v481_v55, %v299_v32  ;;  %v308_v35 = vshrl.u32 %v482_v58, %v299_v32  ;;  %v311_v45 = vshrl.u32 %v483_v61, %v299_v32 }
 0x18e   :  { %v314_v2 = vshrl.u32 %v484_v0, %v299_v32  ;;  %v300_v53 = vshrl.u32 %v479_v50, %v299_v32  ;;  %vm318_vm0 = vcmp.lt.s32.totalorder %v297_v33, 3  ;;  %vm317_vm1 = vcmp.lt.s32.totalorder %v297_v33, 2 }
 0x18f   :  { %v303_v44 = vor.u32 %v302_v39, %v301_v36  ;;  %v306_v46 = vor.u32 %v305_v40, %v304_v38  ;;  %v309_v47 = vor.u32 %v308_v35, %v307_v41  ;;  %v312_v48 = vor.u32 %v311_v45, %v310_v43 }
 0x190   :  { %v315_v52 = vor.u32 %v314_v2, %v313_v4  ;;  %v332_v0 = vshll.u32 %v292_v34, 8 }
 0x191   :  { %v321_v49 = vsel %vm319_vm15, %v309_v47, 2102212464  ;;  %v324_v55 = vsel %vm316_vm14, %v303_v44, %v306_v46  ;;  %v328_v51 = vsel %vm316_vm14, %v306_v46, %v309_v47  ;;  %v325_v58 = vsel %vm319_vm15, %v312_v48, 920167782 }
 0x192   :  { %v329_v54 = vsel %vm319_vm15, %v315_v52, 1326507024  ;;  %v326_v61 = vsel %vm318_vm0, %v309_v47, %v325_v58  ;;  %v320_v57 = vsel %vm316_vm14, %v300_v53, %v303_v44  ;;  %v322_v59 = vsel %vm318_vm0, %v306_v46, %v321_v49 }
 0x193   :  { %v330_v56 = vsel %vm318_vm0, %v312_v48, %v329_v54  ;;  %v327_v60 = vsel %vm317_vm1, %v324_v55, %v326_v61  ;;  %v323_v9 = vsel %vm317_vm1, %v320_v57, %v322_v59  ;;  %v272_v46 = vrot.slane %v604_v19, %v512_v7 }
 0x194   :  { %v331_v62 = vsel %vm317_vm1, %v328_v51, %v330_v56  ;;  %v633_v3 = vmul.u32.u64.low %v332_v0, %v327_v60  ;;  %v634_v5 = vmul.u32.u64.high %v332_v0, %v327_v60, %v633_v3  ;;  %v339_v10 = vmul.u32 %v332_v0, %v323_v9 }
 0x195   :  { %v630_v63 = vmul.u32.u64.low %v332_v0, %v331_v62  ;;  %v631_v1 = vmul.u32.u64.high %v332_v0, %v331_v62, %v630_v63  ;;  %v392_v49 = vrot.slane %v604_v19, %v524_v13  ;;  %v398_v7 = vrot.slane %v604_v19, %v545_v37 }
 0x196   :  { %v342_v50 = vadd.s32 1, %v634_v5 }
 0x197   :  { %vm341_vm2 = vc.u32 %v631_v1, %v633_v3  ;;  %v340_v6 = vadd.s32 %v633_v3, %v631_v1  ;;  %v393_v61 = vmul.f32 %v392_v49, %v610_v25 }
 0x198   :  { %v343_v12 = vsel %vm341_vm2, %v342_v50, %v634_v5 }
 0x199   :  { %v344_v14 = vadd.s32 %v343_v12, %v339_v10 }
 0x19b   :  { %v345_v15 = vadd.s32 536870912, %v344_v14 }
 0x19d   :  { %v346_v16 = vshrl.u32 %v345_v15, 30 }
 0x19f   :  { %v347_v17 = vshll.u32 %v346_v16, 30  ;;  %v370_v40 = vsub.s32 4, %v346_v16 }
 0x1a1   :  { %v348_v18 = vsub.s32 %v344_v14, %v347_v17  ;;  %v371_v43 = vsel %vm286_vm4, %v370_v40, %v346_v16 }
 0x1a2   :  { %v373_v45 = vsel %vm285_vm5, 0, %v371_v43 }
 0x1a3   :  { %v350_v20 = vsub.s32 0, %v348_v18  ;;  %v377_v4 = vadd.s32 3, %v373_v45 }
 0x1a5   :  { %v422_v21 = vmin.u32 %v350_v20, %v348_v18  ;;  %v378_v2 = vand.u32 3, %v377_v4 }
 0x1a7   :  { %v352_v22 = vclz %v422_v21  ;;  %vm383_vm6 = vcmp.eq.s32.totalorder %v378_v2, 2  ;;  %vm380_vm7 = vcmp.eq.s32.totalorder %v378_v2, 0  ;;  %vm379_vm8 = vcmp.lt.s32.totalorder %v378_v2, 2 }
 0x1a9   :  { %v423_v26 = vadd.s32 4294967294, %v352_v22 }
 0x1ab   :  { %vm424_vm3 = vcmp.lt.s32.totalorder %v423_v26, 0 }
 0x1ac   :  { %v355_v24 = vsel %vm424_vm3, 0, %v423_v26 }
 0x1ad   :  { %v356_v27 = vsub.s32 32, %v355_v24  ;;  %v360_v28 = vsub.s32 4294967266, %v355_v24  ;;  %v357_v29 = vshll.u32 %v348_v18, %v355_v24 }
 0x1af   :  { %v358_v30 = vshrl.u32 %v340_v6, %v356_v27  ;;  %v361_v31 = vadd.s32 127, %v360_v28 }
 0x1b1   :  { %v359_v8 = vor.u32 %v358_v30, %v357_v29  ;;  %v362_v32 = vshll.u32 %v361_v31, 23 }
 0x1b3   :  { %v363_v11 = vor.u32 4788187, %v362_v32  ;;  %v366_v36 = vcvt.s32.f32 %v359_v8 }
 0x1b5   :  { %v364_v33 = vand.u32 2147483647, %v363_v11 }
 0x1b7   :  { %v367_v38 = vmul.f32 %v366_v36, %v364_v33 }
 0x1b9   :  { %v368_v39 = vxor.u32 2147483648, %v367_v38 }
 0x1bb   :  { %v369_v41 = vsel %vm286_vm4, %v368_v39, %v367_v38 }
 0x1bc   :  { %v372_v35 = vsel %vm285_vm5, %v613_v23, %v369_v41 }
 0x1bd   :  { %465 = vcosq.f32 %v372_v35 }
 0x1be   :  { %467 = vsinq.f32 %v372_v35 }
 0x1bf   :  { %469 = vtanh.f32 %v610_v25 }
 0x1ca   :  { %v466_v34 = vpop.eup %465 }
 0x1cb   :  { %v468_v44 = vpop.eup %467  ;;  %v384_v47 = vxor.u32 2147483648, %v466_v34 }
 0x1cc   :  { %v470_v48 = vpop.eup %469  ;;  %v381_v52 = vxor.u32 2147483648, %v468_v44 }
 0x1cd   :  { %v385_v42 = vsel %vm383_vm6, %v384_v47, %v468_v44  ;;  %v273_v51 = vmul.f32 %v470_v48, %v272_v46 }
 0x1ce   :  { %v382_v55 = vsel %vm380_vm7, %v466_v34, %v381_v52 }
 0x1cf   :  { %v386_v53 = vsel %vm379_vm8, %v382_v55, %v385_v42 }
 0x1d0   :  { %v387_v58 = vsel %vm376_vm9, nan, %v386_v53 }
 0x1d1   :  { %v388_v54 = vmul.f32 %v387_v58, %v273_v51 }
 0x1d3   :  { %v394_v56 = vadd.f32 %v393_v61, %v388_v54 }
 0x1d5   :  { %v399_v0 = vadd.f32 %v398_v7, %v394_v56 }
 0x1d7   :  { %v401_v57 = vsel %vm400_vm10, %v399_v0, -inf }
 0x1d8   :  { %402 = vmax.xlane.f32.xlu1 %v401_v57 }
 0x261   :  { %v403_v13 = vpop.xlane.xlu1 %402 }
 0x262   :  { %v404_v59 = vsub.f32 %v399_v0, %v403_v13 }
 0x264   :  { %v405_v60 = vmul.f32 1.442695, %v404_v59 }
 0x266   :  { %471 = vpow2.f32 %v405_v60 }
 0x273   :  { %v472_v62 = vpop.eup %471 }
 0x274   :  { %v407_v23 = vsel %vm400_vm10, %v472_v62, 0.0 }
 0x275   :  { %408 = vadd.xlane.f32.xlu0 %v407_v23 }
 0x2fe   :  { %v409_v63 = vpop.xlane.xlu0 %408 }
 0x2ff   :  { %473 = vrcp.f32 %v409_v63 }
 0x30c   :  { %v474_v25 = vpop.eup %473 }
 0x30d   :  { %v411_v1 = vmul.f32 %v474_v25, %v472_v62 }
 0x30f   :  { %412 = vst.msk [vmem:[%s661_s2] sm:$0xff] %vm400_vm10, %v411_v1 }

</bundles_post_ra>
